<compile_context>
chip_gen: v5e
topology: v5e:2x2
jax: 0.10.0
libtpu: 0.0.40
codegen_flags: <defaults>
</compile_context>

<pallas_src>
import math

import jax
import jax.numpy as jnp
from jax.experimental import pallas as pl
from jax.experimental.pallas import tpu as pltpu

# ---- model hyper-parameters (mirror setting_param / linear_param) ----
NUM_DESCRIPTORS = 210   # len(Descriptors._descList) in RDKit (fixed synthetic value)
OUT_LIN = 64            # linear_param['out_lin']
NUM_LAYERS = 3          # linear_param['num_layers']
NUM_CLASSES = 2         # linear_param['classification']
BATCH = 8
LEAKY_SLOPE = 0.01      # F.leaky_relu default
BN_EPS = 1e-5

# ---- kernel layout constants ----
H_PAD = 128             # lane width of every hidden activation and of the packed weight operand
OUT_PAD = 8             # narrow output width (full last dim of the out array); logits in lanes [0,2)
MAX_BATCH_TILE = 2048   # rows per grid step (review item: amortize ~0.35us/step overhead)

H1, H2, H3 = OUT_LIN, OUT_LIN // 2, OUT_LIN // 4   # 64, 32, 16
L1_LO, L1_HI = 64, 96          # lanes carrying layer-1 activations
L2_LO, L2_HI = 96, 112         # lanes carrying layer-2 activations
VROW = 112                     # first packed-vector row inside the [128,128] operand


def _leaky_relu(h):
    return jnp.where(h > 0, h, LEAKY_SLOPE * h)


def desc_model_kernel(x_ref, w0_ref, wcat_ref, out_ref):
    """Whole forward pass for one batch tile.

    wcat_ref is the single packed resident operand [128, 128]:
      rows   0: 64, lanes 64: 96  -> w1  (64 x 32)
      rows  64: 96, lanes 96:112  -> w2  (32 x 16)
      rows  96:112, lanes  0:  2  -> w3  (16 x  2)
      rows 112:119                -> s0, t0', s1, t1', s2, t2', b3 (each placed at the lanes
                                     where that layer's activations live; zeros elsewhere)
    Because each layer's live activation lanes coincide exactly with the packed rows of the
    next layer's weight (and every other lane is exactly zero), every later matmul is a plain
    K=128 dot against the SAME operand.
    """
    wcat = wcat_ref[...]                                # [128, 128]
    vecs = wcat[VROW:VROW + 8, :]                       # [8, 128] packed scale/shift/bias rows
    s0, t0 = vecs[0:1, :], vecs[1:2, :]
    s1, t1 = vecs[2:3, :], vecs[3:4, :]
    s2, t2 = vecs[4:5, :], vecs[5:6, :]
    b3 = vecs[6:7, :]

    # Layer 0: Linear(210,64) + BN + leaky_relu. K=210 (unpadded features); real lanes [0,64).
    h = jnp.dot(x_ref[...], w0_ref[...], preferred_element_type=jnp.float32)
    h = _leaky_relu(h * s0 + t0)

    # Layer 1: Linear(64,32) + BN + leaky_relu. Real lanes of the result: [64,96).
    h = jnp.dot(h, wcat, preferred_element_type=jnp.float32)
    h = _leaky_relu(h * s1 + t1)

    # Layer 2: Linear(32,16) + BN + leaky_relu. Real lanes: [96,112).
    h = jnp.dot(h, wcat, preferred_element_type=jnp.float32)
    h = _leaky_relu(h * s2 + t2)

    # Final classification Linear(16,2), no BN / no activation. Logits land in lanes [0,2).
    h = jnp.dot(h, wcat, preferred_element_type=jnp.float32) + b3
    out_ref[...] = h[:, :OUT_PAD]


# ----------------------------- parameter construction -----------------------------

def _init_linear(key, fan_in, fan_out):
    """PyTorch nn.Linear default init: U(-1/sqrt(fan_in), 1/sqrt(fan_in)); weight stored [in, out]."""
    kw, kb = jax.random.split(key)
    bound = 1.0 / math.sqrt(fan_in)
    w = jax.random.uniform(kw, (fan_in, fan_out), jnp.float32, -bound, bound)
    b = jax.random.uniform(kb, (fan_out,), jnp.float32, -bound, bound)
    return w, b


def _init_bn_folded(key, dim):
    """Deterministic (but non-trivial) eval-mode BatchNorm1d params, folded to scale/shift."""
    kg, kb, km, kv = jax.random.split(key, 4)
    gamma = 1.0 + 0.1 * jax.random.normal(kg, (dim,), jnp.float32)
    beta = 0.1 * jax.random.normal(kb, (dim,), jnp.float32)
    running_mean = 0.1 * jax.random.normal(km, (dim,), jnp.float32)
    running_var = 1.0 + 0.5 * jax.random.uniform(kv, (dim,), jnp.float32)
    scale = gamma / jnp.sqrt(running_var + BN_EPS)
    shift = beta - running_mean * scale
    return scale, shift


def build_raw_params(key):
    """Raw (unpadded, unfolded) params — used by the pure-JAX reference."""
    dims = [NUM_DESCRIPTORS, OUT_LIN, OUT_LIN // 2, OUT_LIN // 4, NUM_CLASSES]
    keys = jax.random.split(key, 8)
    layers = []
    for i in range(NUM_LAYERS):
        w, b = _init_linear(keys[2 * i], dims[i], dims[i + 1])
        s, t = _init_bn_folded(keys[2 * i + 1], dims[i + 1])
        layers.append((w, b, s, t))
    w3, b3 = _init_linear(keys[6], dims[NUM_LAYERS], dims[NUM_LAYERS + 1])
    return layers, (w3, b3)


def pack_kernel_params(layers, final):
    """Fold Linear biases into the BN shifts and pack w1/w2/w3 + all vectors into ONE operand."""
    (w0, b0, s0, t0), (w1, b1, s1, t1), (w2, b2, s2, t2) = layers
    w3, b3 = final

    # w0: [210, 128]; real output columns 0:64, the rest exactly zero (so later lanes stay zero).
    w0p = jnp.zeros((NUM_DESCRIPTORS, H_PAD), jnp.float32).at[:, :H1].set(w0)

    wcat = jnp.zeros((H_PAD, H_PAD), jnp.float32)
    # Layer-1 weight: input rows 0:64 (lanes of h0), output columns routed to lanes 64:96.
    wcat = wcat.at[0:H1, L1_LO:L1_HI].set(w1)
    # Layer-2 weight: input rows 64:96 (lanes of h1), output columns routed to lanes 96:112.
    wcat = wcat.at[L1_LO:L1_HI, L2_LO:L2_HI].set(w2)
    # Final classifier weight: input rows 96:112 (lanes of h2), logits routed to lanes 0:2.
    wcat = wcat.at[L2_LO:L2_HI, 0:NUM_CLASSES].set(w3)

    # Folded BN scale/shift (bias folded: (x@W+b)*s+t == (x@W)*s + (b*s+t)) and final bias,
    # each placed at the lanes where that layer's activations live; zeros everywhere else.
    wcat = wcat.at[VROW + 0, 0:H1].set(s0)
    wcat = wcat.at[VROW + 1, 0:H1].set(b0 * s0 + t0)
    wcat = wcat.at[VROW + 2, L1_LO:L1_HI].set(s1)
    wcat = wcat.at[VROW + 3, L1_LO:L1_HI].set(b1 * s1 + t1)
    wcat = wcat.at[VROW + 4, L2_LO:L2_HI].set(s2)
    wcat = wcat.at[VROW + 5, L2_LO:L2_HI].set(b2 * s2 + t2)
    wcat = wcat.at[VROW + 6, 0:NUM_CLASSES].set(b3)
    return w0p, wcat


# ----------------------------- forward wrapper -----------------------------

def _batch_tiling(batch):
    """Pick (batch_tile, grid_steps): >=2 steps for B>=32 (feeds both v7x TensorCores),
    single tile for tiny batches where per-step overhead dominates."""
    if batch < 8:
        return batch, 1                                # full-dim block
    if batch < 32:
        tb = ((batch + 7) // 8) * 8
        return tb, 1
    n_steps = max(2, pl.cdiv(batch, MAX_BATCH_TILE))
    tb = min(MAX_BATCH_TILE, ((pl.cdiv(batch, n_steps) + 7) // 8) * 8)
    return tb, pl.cdiv(batch, tb)


def desc_model_forward(x, kparams):
    w0p, wcat = kparams
    B, D = x.shape
    assert D == NUM_DESCRIPTORS
    x = x.astype(jnp.float32)

    tb, grid = _batch_tiling(B)

    # Advisory cost of the shapes actually executed (layer 0 at K=210, layers 1-3 at K=128).
    flops = 2 * grid * tb * (NUM_DESCRIPTORS * H_PAD + 3 * H_PAD * H_PAD)
    bytes_accessed = 4 * (B * NUM_DESCRIPTORS + w0p.size + wcat.size + B * OUT_PAD)

    out = pl.pallas_call(
        desc_model_kernel,
        out_shape=jax.ShapeDtypeStruct((B, OUT_PAD), jnp.float32),
        grid_spec=pltpu.PrefetchScalarGridSpec(
            num_scalar_prefetch=0,
            grid=(grid,),
            in_specs=[
                # x: batch-tiled, feature dim kept at its true (full) size 210 — no padded copy.
                pl.BlockSpec((tb, NUM_DESCRIPTORS), lambda i: (i, 0)),
                # w0: resident across the batch grid.
                pl.BlockSpec((NUM_DESCRIPTORS, H_PAD), lambda i: (0, 0)),
                # packed w1/w2/w3 + scale/shift/bias rows: single resident operand.
                pl.BlockSpec((H_PAD, H_PAD), lambda i: (0, 0)),
            ],
            out_specs=pl.BlockSpec((tb, OUT_PAD), lambda i: (i, 0)),
        ),
        compiler_params=pltpu.CompilerParams(
            dimension_semantics=("parallel",),
            vmem_limit_bytes=32 * 1024 * 1024,   # explicit: v5e scoped default is only 16 MiB
        ),
        cost_estimate=pl.CostEstimate(
            flops=flops, transcendentals=0, bytes_accessed=bytes_accessed),
    )(x, w0p, wcat)

    # Real logits live in lanes [0, NUM_CLASSES) (cheap wrapper-side slice).
    return out[:, :NUM_CLASSES]


def reference_forward(x, layers, final):
    """Pure-JAX reference in the original (unfolded, unpadded) PyTorch order."""
    h = x.astype(jnp.float32)
    for (w, b, s, t) in layers:
        h = h @ w + b          # Linear (with bias)
        h = h * s + t          # BatchNorm1d (eval, running stats)
        h = jnp.where(h > 0, h, LEAKY_SLOPE * h)  # leaky_relu; dropout = identity in eval
    w3, b3 = final
    return h @ w3 + b3


if __name__ == "__main__":
    key = jax.random.PRNGKey(0)
    k_x, k_p = jax.random.split(key)
    # Synthetic "descriptor" features: the real model computes RDKit descriptors per SMILES.
    # TODO(synk): RDKit descriptor computation / SMILES dict lookup is host-side preprocessing,
    # not expressible in a TPU kernel; the kernel starts from the [B, 210] descriptor tensor.
    x = jax.random.normal(k_x, (BATCH, NUM_DESCRIPTORS), jnp.float32)

    layers, final = build_raw_params(k_p)
    kparams = pack_kernel_params(layers, final)

    out = desc_model_forward(x, kparams)
    out = jax.block_until_ready(out)

    ref = reference_forward(x, layers, final)
    assert out.shape == (BATCH, NUM_CLASSES)
    assert jnp.allclose(out, ref, atol=1e-4, rtol=1e-4), "mismatch vs. reference"
    print("KERNEL_OK")
</pallas_src>

<mosaic_0001>
module attributes {stable_mosaic.version = 11 : i64} {
  func.func @desc_model_kernel(%arg0: i32, %arg1: memref<8x210xf32, #tpu.memory_space<vmem>>, %arg2: memref<210x128xf32, #tpu.memory_space<vmem>>, %arg3: memref<128x128xf32, #tpu.memory_space<vmem>>, %arg4: memref<8x8xf32, #tpu.memory_space<vmem>>) attributes {dimension_semantics = [#tpu.dimension_semantics<parallel>], iteration_bounds = array<i64: 1>, scalar_prefetch = 0 : i64, scratch_operands = 0 : i64, tpu.core_type = #tpu.core_type<tc>, window_params = [{transform_indices = @transform_0, window_bounds = array<i64: 8, 210>}, {pipeline_mode = #tpu.pipeline_mode<synchronous>, transform_indices = @transform_1, window_bounds = array<i64: 210, 128>}, {pipeline_mode = #tpu.pipeline_mode<synchronous>, transform_indices = @transform_2, window_bounds = array<i64: 128, 128>}, {transform_indices = @transform_3, window_bounds = array<i64: 8, 8>}]} {
    %c0 = arith.constant 0 : index
    %c0_0 = arith.constant 0 : index
    %0 = vector.load %arg3[%c0, %c0_0] : memref<128x128xf32, #tpu.memory_space<vmem>>, vector<128x128xf32>
    %1 = vector.extract_strided_slice %0 {offsets = [112, 0], sizes = [8, 128], strides = [1, 1]} : vector<128x128xf32> to vector<8x128xf32>
    %2 = vector.extract_strided_slice %1 {offsets = [0, 0], sizes = [1, 128], strides = [1, 1]} : vector<8x128xf32> to vector<1x128xf32>
    %3 = vector.extract_strided_slice %1 {offsets = [1, 0], sizes = [1, 128], strides = [1, 1]} : vector<8x128xf32> to vector<1x128xf32>
    %4 = vector.extract_strided_slice %1 {offsets = [2, 0], sizes = [1, 128], strides = [1, 1]} : vector<8x128xf32> to vector<1x128xf32>
    %5 = vector.extract_strided_slice %1 {offsets = [3, 0], sizes = [1, 128], strides = [1, 1]} : vector<8x128xf32> to vector<1x128xf32>
    %6 = vector.extract_strided_slice %1 {offsets = [4, 0], sizes = [1, 128], strides = [1, 1]} : vector<8x128xf32> to vector<1x128xf32>
    %7 = vector.extract_strided_slice %1 {offsets = [5, 0], sizes = [1, 128], strides = [1, 1]} : vector<8x128xf32> to vector<1x128xf32>
    %8 = vector.extract_strided_slice %1 {offsets = [6, 0], sizes = [1, 128], strides = [1, 1]} : vector<8x128xf32> to vector<1x128xf32>
    %c0_1 = arith.constant 0 : index
    %c0_2 = arith.constant 0 : index
    %9 = vector.load %arg1[%c0_1, %c0_2] : memref<8x210xf32, #tpu.memory_space<vmem>>, vector<8x210xf32>
    %c0_3 = arith.constant 0 : index
    %c0_4 = arith.constant 0 : index
    %10 = vector.load %arg2[%c0_3, %c0_4] : memref<210x128xf32, #tpu.memory_space<vmem>>, vector<210x128xf32>
    %cst = arith.constant dense<0.000000e+00> : vector<8x128xf32>
    %11 = tpu.matmul %9, %10, %cst {dimension_numbers = #tpu.dot_dimension_numbers<[1], [0], [0], [1], [0, 0, 1, 1], [], []>} : vector<8x210xf32>, vector<210x128xf32>, vector<8x128xf32> -> vector<8x128xf32>
    %12 = vector.broadcast %2 : vector<1x128xf32> to vector<8x128xf32>
    %13 = arith.mulf %11, %12 : vector<8x128xf32>
    %14 = vector.broadcast %3 : vector<1x128xf32> to vector<8x128xf32>
    %15 = arith.addf %13, %14 : vector<8x128xf32>
    %cst_5 = arith.constant 0.000000e+00 : f32
    %16 = vector.broadcast %cst_5 : f32 to vector<8x128xf32>
    %17 = arith.cmpf ogt, %15, %16 : vector<8x128xf32>
    %cst_6 = arith.constant 0.00999999977 : f32
    %18 = vector.broadcast %cst_6 : f32 to vector<8x128xf32>
    %19 = arith.mulf %18, %15 : vector<8x128xf32>
    %20 = arith.select %17, %15, %19 : vector<8x128xi1>, vector<8x128xf32>
    %cst_7 = arith.constant dense<0.000000e+00> : vector<8x128xf32>
    %21 = tpu.matmul %20, %0, %cst_7 {dimension_numbers = #tpu.dot_dimension_numbers<[1], [0], [0], [1], [0, 0, 1, 1], [], []>} : vector<8x128xf32>, vector<128x128xf32>, vector<8x128xf32> -> vector<8x128xf32>
    %22 = vector.broadcast %4 : vector<1x128xf32> to vector<8x128xf32>
    %23 = arith.mulf %21, %22 : vector<8x128xf32>
    %24 = vector.broadcast %5 : vector<1x128xf32> to vector<8x128xf32>
    %25 = arith.addf %23, %24 : vector<8x128xf32>
    %cst_8 = arith.constant 0.000000e+00 : f32
    %26 = vector.broadcast %cst_8 : f32 to vector<8x128xf32>
    %27 = arith.cmpf ogt, %25, %26 : vector<8x128xf32>
    %cst_9 = arith.constant 0.00999999977 : f32
    %28 = vector.broadcast %cst_9 : f32 to vector<8x128xf32>
    %29 = arith.mulf %28, %25 : vector<8x128xf32>
    %30 = arith.select %27, %25, %29 : vector<8x128xi1>, vector<8x128xf32>
    %cst_10 = arith.constant dense<0.000000e+00> : vector<8x128xf32>
    %31 = tpu.matmul %30, %0, %cst_10 {dimension_numbers = #tpu.dot_dimension_numbers<[1], [0], [0], [1], [0, 0, 1, 1], [], []>} : vector<8x128xf32>, vector<128x128xf32>, vector<8x128xf32> -> vector<8x128xf32>
    %32 = vector.broadcast %6 : vector<1x128xf32> to vector<8x128xf32>
    %33 = arith.mulf %31, %32 : vector<8x128xf32>
    %34 = vector.broadcast %7 : vector<1x128xf32> to vector<8x128xf32>
    %35 = arith.addf %33, %34 : vector<8x128xf32>
    %cst_11 = arith.constant 0.000000e+00 : f32
    %36 = vector.broadcast %cst_11 : f32 to vector<8x128xf32>
    %37 = arith.cmpf ogt, %35, %36 : vector<8x128xf32>
    %cst_12 = arith.constant 0.00999999977 : f32
    %38 = vector.broadcast %cst_12 : f32 to vector<8x128xf32>
    %39 = arith.mulf %38, %35 : vector<8x128xf32>
    %40 = arith.select %37, %35, %39 : vector<8x128xi1>, vector<8x128xf32>
    %cst_13 = arith.constant dense<0.000000e+00> : vector<8x128xf32>
    %41 = tpu.matmul %40, %0, %cst_13 {dimension_numbers = #tpu.dot_dimension_numbers<[1], [0], [0], [1], [0, 0, 1, 1], [], []>} : vector<8x128xf32>, vector<128x128xf32>, vector<8x128xf32> -> vector<8x128xf32>
    %42 = vector.broadcast %8 : vector<1x128xf32> to vector<8x128xf32>
    %43 = arith.addf %41, %42 : vector<8x128xf32>
    %44 = vector.extract_strided_slice %43 {offsets = [0, 0], sizes = [8, 8], strides = [1, 1]} : vector<8x128xf32> to vector<8x8xf32>
    %c0_14 = arith.constant 0 : index
    %c0_15 = arith.constant 0 : index
    %45 = vector.load %arg4[%c0_14, %c0_15] : memref<8x8xf32, #tpu.memory_space<vmem>>, vector<8x8xf32>
    tpu.vector_store %arg4[%c0_14, %c0_15], %44 {strides = array<i32>} : memref<8x8xf32, #tpu.memory_space<vmem>>, vector<8x8xf32>,
    return
  }
  func.func @transform_0(%arg0: i32) -> (i32, i32) {
    %c0_i32 = arith.constant 0 : i32
    %c0_i32_0 = arith.constant 0 : i32
    return %arg0, %c0_i32 : i32, i32
  }
  func.func @transform_1(%arg0: i32) -> (i32, i32) {
    %c0_i32 = arith.constant 0 : i32
    %c0_i32_0 = arith.constant 0 : i32
    %c0_i32_1 = arith.constant 0 : i32
    return %c0_i32, %c0_i32_0 : i32, i32
  }
  func.func @transform_2(%arg0: i32) -> (i32, i32) {
    %c0_i32 = arith.constant 0 : i32
    %c0_i32_0 = arith.constant 0 : i32
    %c0_i32_1 = arith.constant 0 : i32
    return %c0_i32, %c0_i32_0 : i32, i32
  }
  func.func @transform_3(%arg0: i32) -> (i32, i32) {
    %c0_i32 = arith.constant 0 : i32
    %c0_i32_0 = arith.constant 0 : i32
    return %arg0, %c0_i32 : i32, i32
  }
}

</mosaic_0001>

<bundles_post_ra>
// kernel: tpu_custom_call.1
= control target key start
LH: loop header
LB: loop body
LE: loop exit
PB: predicated region body
PF: predicated region fallthrough
CT: control target
= control target key end

     0   :  { %8 = vsyncpa [#allocation3], 0  ;;  %s415_s0 = inlined_call_operand.hbm [shape: f32[8,210], index: 0, kind: input, shape index: {}]   ;;  %s416_s1 = inlined_call_operand.hbm [shape: f32[210,128], index: 1, kind: input, shape index: {}]   ;;  %s417_s2 = inlined_call_operand.hbm [shape: f32[128,128], index: 2, kind: input, shape index: {}]   ;;  %s418_s3 = inlined_call_operand.hbm [shape: f32[8,8], index: 3, kind: output, shape index: {}]  }
   0x1   :  { %9 = vsyncpa [#allocation6], 0  ;;  %s26_s14 = sshll.u32 %s416_s1, 4  ;;  %s27_s14 = int_to_ptr.hbm [resolvable:$true] %s26_s14 }
   0x2   :  { %10 = vsyncpa [#allocation4], 0  ;;  %s365_s15 = smov [#allocation5]   ;;  %s16_s19 = sshll.u32 %s415_s0, 4  ;;  %s17_s19 = int_to_ptr.hbm [resolvable:$true] %s16_s19 }
   0x3   :  { %s28_s16 = sshll.u32 %s365_s15, 4  ;;  %s366_s20 = smov 128   ;;  %s29_s16 = int_to_ptr.vmem [resolvable:$true] %s28_s16 }
   0x4   :  { %s367_s21 = smov 8   ;;  %s368_s22 = smov [#allocation2]  }
   0x5   :  { %34 = dma.hbm_to_vmem [thread:$0]  %s27_s14, 3456, %s29_s16, [#allocation6], %s366_s20, %s366_s20, %s367_s21  }
   0x6   :  { %s18_s23 = sshll.u32 %s368_s22, 4  ;;  %s39_s26 = sshll.u32 %s417_s2, 4  ;;  %s19_s23 = int_to_ptr.vmem [resolvable:$true] %s18_s23  ;;  %s40_s26 = int_to_ptr.hbm [resolvable:$true] %s39_s26 }
   0x7   :  { %21 = dma.hbm_to_vmem [thread:$0]  %s17_s19, 256, %s19_s23, [#allocation3]  }
   0x8   :  { %s369_s1 = smov [#allocation7]  }
   0x9   :  { %s41_s27 = sshll.u32 %s369_s1, 4  ;;  %s42_s27 = int_to_ptr.vmem [resolvable:$true] %s41_s27 }
   0xa   :  { %47 = dma.hbm_to_vmem [thread:$0]  %s40_s26, 2048, %s42_s27, [#allocation6], %s366_s20, %s366_s20, %s367_s21  }
   0xb   :  { %359 = dma.done.wait [#allocation3], 256  }
   0xc   :  { %360 = vsyncadd [#allocation3], 4294967040 }
   0xd   :  { %361 = dma.done.wait [#allocation6], 5504  }
   0xe   :  { %362 = vsyncadd [#allocation6], 4294961792  ;;  %v93_v0 = vld [vmem:[#allocation5 + $0x78] sm:$0xff]  ;;  %v92_v1 = vld [vmem:[#allocation5 + $0x70] sm:$0xff]  ;;  %vm109_vm0 = vcmask 1041408   ;;  %vm105_vm1 = vcmask 670720  }
   0xf   :  { %113 = vmatpush.msra.mxu0 %v93_v0  ;;  %v91_v2 = vld [vmem:[#allocation5 + $0x68] sm:$0xff]  ;;  %v104_v3 = vld [vmem:[#allocation5 + $0xd0] sm:$0x3]  ;;  %v90_v5 = vld [vmem:[#allocation5 + $0x60] sm:$0xff]  ;;  %s370_s0 = smov [#allocation8]   ;;  %s244_s30 = sshll.u32 %s418_s3, 4  ;;  %s245_s30 = int_to_ptr.hbm [resolvable:$true] %s244_s30 }
  0x10   :  { %v103_v4 = vld [vmem:[#allocation5 + $0xc8] sm:$0xff]  ;;  %255 = vmatpush.msk.msra.mxu1 %vm109_vm0, %v104_v3  ;;  %v102_v6 = vld [vmem:[#allocation5 + $0xc0] sm:$0xff]  ;;  %v89_v7 = vld [vmem:[#allocation5 + $0x58] sm:$0xff]  ;;  %s242_s2 = sshll.u32 %s370_s0, 4  ;;  %vm235_vm5 = vcmask 64512   ;;  %s243_s2 = int_to_ptr.vmem [resolvable:$true] %s242_s2 }
  0x11   :  { %114 = vmatpush.msra.mxu0 %v92_v1  ;;  %v101_v8 = vld [vmem:[#allocation5 + $0xb8] sm:$0xff]  ;;  %v88_v9 = vld [vmem:[#allocation5 + $0x50] sm:$0xff]  ;;  %v87_v12 = vld [vmem:[#allocation5 + $0x48] sm:$0xff] }
  0x12   :  { %139 = vmatpush.msra.mxu1 %v103_v4  ;;  %v100_v10 = vld [vmem:[#allocation5 + $0xb0] sm:$0xff]  ;;  %v99_v13 = vld [vmem:[#allocation5 + $0xa8] sm:$0xff]  ;;  %v73_v15 = vld [vmem:[#allocation7 + $0x68] sm:$0xff] }
  0x13   :  { %115 = vmatpush.msra.mxu0 %v91_v2  ;;  %v75_v11 = vld [vmem:[#allocation7 + $0x78] sm:$0xff]  ;;  %v400_v14 = vld [vmem:[#allocation7 + $0x70] sm:$0xff]  ;;  %v86_v16 = vld [vmem:[#allocation5 + $0x40] sm:$0xff] }
  0x14   :  { %140 = vmatpush.msra.mxu1 %v102_v6  ;;  %160 = vmatpush.msra.mxu2 %v75_v11  ;;  %v98_v17 = vld [vmem:[#allocation5 + $0xa0] sm:$0xff]  ;;  %v72_v18 = vld [vmem:[#allocation7 + $0x60] sm:$0xff]  ;;  %v71_v21 = vld [vmem:[#allocation7 + $0x58] sm:$0xff]  ;;  %v153_v46 = vperm.slane %v400_v14, 0  ;;  %v155_v49 = vperm.slane %v400_v14, 1  ;;  %v180_v54 = vperm.slane %v400_v14, 2 }
  0x15   :  { %116 = vmatpush.msra.mxu0 %v90_v5  ;;  %187 = vmatpush.msra.mxu3 %v75_v11  ;;  %v85_v19 = vld [vmem:[#allocation5 + $0x38] sm:$0xff]  ;;  %v84_v22 = vld [vmem:[#allocation5 + $0x30] sm:$0xff]  ;;  %v70_v24 = vld [vmem:[#allocation7 + $0x50] sm:$0xff]  ;;  %v182_v55 = vperm.slane %v400_v14, 3  ;;  %v207_v61 = vperm.slane %v400_v14, 4  ;;  %v209_v62 = vperm.slane %v400_v14, 5 }
  0x16   :  { %141 = vmatpush.msra.mxu1 %v101_v8  ;;  %161 = vmatpush.msra.mxu2 %v400_v14  ;;  %v97_v20 = vld [vmem:[#allocation5 + $0x98] sm:$0xff]  ;;  %v96_v23 = vld [vmem:[#allocation5 + $0x90] sm:$0xff]  ;;  %v83_v25 = vld [vmem:[#allocation5 + $0x28] sm:$0xff]  ;;  %v214_v4 = vperm.slane %v400_v14, 6 }
  0x17   :  { %117 = vmatpush.msra.mxu0 %v89_v7  ;;  %188 = vmatpush.msra.mxu3 %v400_v14  ;;  %v95_v26 = vld [vmem:[#allocation5 + $0x88] sm:$0xff]  ;;  %v69_v27 = vld [vmem:[#allocation7 + $0x48] sm:$0xff]  ;;  %v77_v30 = vld [vmem:[#allocation2 + $0x8] sm:$0xff] }
  0x18   :  { %142 = vmatpush.msra.mxu1 %v100_v10  ;;  %162 = vmatpush.msra.mxu2 %v73_v15  ;;  %v82_v28 = vld [vmem:[#allocation5 + $0x20] sm:$0xff]  ;;  %v68_v31 = vld [vmem:[#allocation7 + $0x40] sm:$0xff]  ;;  %v67_v33 = vld [vmem:[#allocation7 + $0x38] sm:$0xff] }
  0x19   :  { %118 = vmatpush.msra.mxu0 %v88_v9  ;;  %189 = vmatpush.msra.mxu3 %v73_v15  ;;  %v94_v29 = vld [vmem:[#allocation5 + $0x80] sm:$0xff]  ;;  %v81_v32 = vld [vmem:[#allocation5 + $0x18] sm:$0xff]  ;;  %v80_v34 = vld [vmem:[#allocation5 + $0x10] sm:$0xff] }
  0x1a   :  { %143 = vmatpush.msra.mxu1 %v99_v13  ;;  %163 = vmatpush.msra.mxu2 %v72_v18  ;;  %v66_v35 = vld [vmem:[#allocation7 + $0x30] sm:$0xff]  ;;  %v65_v37 = vld [vmem:[#allocation7 + $0x28] sm:$0xff]  ;;  %v76_v39 = vld [vmem:[#allocation2] sm:$0xff] }
  0x1b   :  { %119 = vmatpush.msra.mxu0 %v87_v12  ;;  %190 = vmatpush.msra.mxu3 %v72_v18  ;;  %v79_v36 = vld [vmem:[#allocation5 + $0x8] sm:$0xff]  ;;  %v78_v38 = vld [vmem:[#allocation5] sm:$0xff]  ;;  %v64_v40 = vld [vmem:[#allocation7 + $0x20] sm:$0xff] }
  0x1c   :  { %144 = vmatpush.msra.mxu1 %v98_v17  ;;  %164 = vmatpush.msra.mxu2 %v71_v21  ;;  %v63_v41 = vld [vmem:[#allocation7 + $0x18] sm:$0xff]  ;;  %v62_v42 = vld [vmem:[#allocation7 + $0x10] sm:$0xff]  ;;  %v61_v43 = vld [vmem:[#allocation7 + $0x8] sm:$0xff] }
  0x1d   :  { %120 = vmatpush.msra.mxu0 %v86_v16  ;;  %191 = vmatpush.msra.mxu3 %v71_v21  ;;  %v60_v44 = vld [vmem:[#allocation7] sm:$0xff] }
  0x1e   :  { %145 = vmatpush.msra.mxu1 %v97_v20  ;;  %165 = vmatpush.msra.mxu2 %v70_v24 }
  0x1f   :  { %121 = vmatpush.msra.mxu0 %v85_v19  ;;  %192 = vmatpush.msra.mxu3 %v70_v24 }
  0x20   :  { %146 = vmatpush.msra.mxu1 %v96_v23  ;;  %166 = vmatpush.msra.mxu2 %v69_v27 }
  0x21   :  { %122 = vmatpush.msra.mxu0 %v84_v22  ;;  %193 = vmatpush.msra.mxu3 %v69_v27 }
  0x22   :  { %147 = vmatpush.msra.mxu1 %v95_v26  ;;  %167 = vmatpush.msra.mxu2 %v68_v31 }
  0x23   :  { %123 = vmatpush.msra.mxu0 %v83_v25  ;;  %194 = vmatpush.msra.mxu3 %v68_v31 }
  0x24   :  { %148 = vmatpush.msra.mxu1 %v94_v29  ;;  %168 = vmatpush.msra.mxu2 %v67_v33 }
  0x25   :  { %124 = vmatpush.msra.mxu0 %v82_v28  ;;  %256 = vmatmul.msk.f32.vlgmr.msra.gmra.mxu1 %vm105_vm1, %v77_v30 }
  0x26   :  { %215 = vmatpush.msrb.mxu1 %v75_v11  ;;  %195 = vmatpush.msra.mxu3 %v67_v33 }
  0x27   :  { %125 = vmatpush.msra.mxu0 %v81_v32  ;;  %169 = vmatpush.msra.mxu2 %v66_v35 }
  0x28   :  { %216 = vmatpush.msrb.mxu1 %v400_v14  ;;  %196 = vmatpush.msra.mxu3 %v66_v35 }
  0x29   :  { %126 = vmatpush.msra.mxu0 %v80_v34  ;;  %170 = vmatpush.msra.mxu2 %v65_v37 }
  0x2a   :  { %217 = vmatpush.msrb.mxu1 %v73_v15  ;;  %197 = vmatpush.msra.mxu3 %v65_v37 }
  0x2b   :  { %127 = vmatpush.msra.mxu0 %v79_v36  ;;  %171 = vmatpush.msra.mxu2 %v64_v40 }
  0x2c   :  { %218 = vmatpush.msrb.mxu1 %v72_v18  ;;  %198 = vmatpush.msra.mxu3 %v64_v40 }
  0x2d   :  { %128 = vmatpush.msra.mxu0 %v78_v38  ;;  %172 = vmatpush.msra.mxu2 %v63_v41 }
  0x2e   :  { %129 = vmatmul.f32.vlgmr.msra.gmra.mxu0 %v76_v39  ;;  %219 = vmatpush.msrb.mxu1 %v71_v21 }
  0x2f   :  { %199 = vmatpush.msra.mxu3 %v63_v41  ;;  %173 = vmatpush.msra.mxu2 %v62_v42 }
  0x30   :  { %220 = vmatpush.msrb.mxu1 %v70_v24 }
  0x31   :  { %200 = vmatpush.msra.mxu3 %v62_v42  ;;  %174 = vmatpush.msra.mxu2 %v61_v43 }
  0x32   :  { %221 = vmatpush.msrb.mxu1 %v69_v27 }
  0x33   :  { %201 = vmatpush.msra.mxu3 %v61_v43  ;;  %175 = vmatpush.msra.mxu2 %v60_v44 }
  0x34   :  { %222 = vmatpush.msrb.mxu1 %v68_v31 }
  0x35   :  { %202 = vmatpush.msra.mxu3 %v60_v44 }
  0x36   :  { %223 = vmatpush.msrb.mxu1 %v67_v33 }
  0x38   :  { %224 = vmatpush.msrb.mxu1 %v66_v35 }
  0x3a   :  { %225 = vmatpush.msrb.mxu1 %v65_v37 }
  0x3c   :  { %226 = vmatpush.msrb.mxu1 %v64_v40 }
  0x3e   :  { %227 = vmatpush.msrb.mxu1 %v63_v41 }
  0x40   :  { %228 = vmatpush.msrb.mxu1 %v62_v42 }
  0x42   :  { %229 = vmatpush.msrb.mxu1 %v61_v43 }
  0x44   :  { %230 = vmatpush.msrb.mxu1 %v60_v44 }
  0xa2   :  { %v150_v45 = vpop.f32.mrf.mxu1 }
  0xab   :  { %v130_v47 = vpop.f32.mrf.mxu0 }
  0xac   :  { %v151_v48 = vadd.f32 %v150_v45, %v130_v47 }
  0xae   :  { %v154_v50 = vmul.f32 %v153_v46, %v151_v48 }
  0xb0   :  { %v156_v51 = vadd.f32 %v155_v49, %v154_v50 }
  0xb2   :  { %vm157_vm2 = vcmp.gt.f32.partialorder %v156_v51, 0.0  ;;  %v158_v52 = vmul.f32 0.01, %v156_v51 }
  0xb4   :  { %v159_v53 = vsel %vm157_vm2, %v156_v51, %v158_v52 }
  0xb5   :  { %176 = vmatmul.f32.vlgmr.msra.gmra.mxu2 %v159_v53 }
 0x138   :  { %v177_v56 = vpop.f32.mrf.mxu2 }
 0x139   :  { %v181_v57 = vmul.f32 %v180_v54, %v177_v56 }
 0x13b   :  { %v183_v58 = vadd.f32 %v182_v55, %v181_v57 }
 0x13d   :  { %vm184_vm3 = vcmp.gt.f32.partialorder %v183_v58, 0.0  ;;  %v185_v59 = vmul.f32 0.01, %v183_v58 }
 0x13f   :  { %v186_v60 = vsel %vm184_vm3, %v183_v58, %v185_v59 }
 0x140   :  { %203 = vmatmul.f32.vlgmr.msra.gmra.mxu3 %v186_v60 }
 0x1c3   :  { %v204_v63 = vpop.f32.mrf.mxu3 }
 0x1c4   :  { %v208_v0 = vmul.f32 %v207_v61, %v204_v63 }
 0x1c6   :  { %v210_v1 = vadd.f32 %v209_v62, %v208_v0 }
 0x1c8   :  { %vm211_vm4 = vcmp.gt.f32.partialorder %v210_v1, 0.0  ;;  %v212_v2 = vmul.f32 0.01, %v210_v1 }
 0x1ca   :  { %v213_v3 = vsel %vm211_vm4, %v210_v1, %v212_v2 }
 0x1cb   :  { %231 = vmatmul.f32.vlgmr.msrb.gmra.mxu1 %v213_v3 }
 0x248   :  { %v232_v5 = vpop.f32.mrf.mxu1 }
 0x249   :  { %v233_v6 = vadd.f32 %v232_v5, %v214_v4 }
 0x24b   :  { %236 = vst.msk [vmem:[#allocation8] sm:$0xff] %vm235_vm5, %v233_v6 }
 0x24c   :  { %247 = dma.vmem_to_hbm [thread:$0]  %s243_s2, 128, %s245_s30, [#allocation4]  }
 0x24d   :  { %363 = dma.done.wait [#allocation4], 128  }
 0x24e   :  { %364 = vsyncadd [#allocation4], 4294967168 }
 0x24f   :  { %252 = vsyncpa [#allocation3], 1 }
 0x250   :  { %253 = vsyncpa [#allocation6], 1 }
 0x251   :  { %254 = vsyncpa [#allocation4], 1 }

</bundles_post_ra>
